<compile_context>
chip_gen: v7x
topology: tpu7x:2x2x1
jax: 0.10.0
libtpu: 0.0.40
codegen_flags: <defaults>
</compile_context>

<pallas_src>
import functools

import jax
import jax.numpy as jnp
from jax.experimental import pallas as pl
from jax.experimental.pallas import tpu as pltpu


def _round_up(x, m):
    return (x + m - 1) // m * m


# ---------------------------------------------------------------------------
# Small-shape path: one MXU pass, whole (padded, lane-dense) arrays in VMEM.
# ---------------------------------------------------------------------------
def _linear_kernel_single(x_ref, w_ref, b_ref, o_ref):
    # x_ref: [Bp, Kp], w_ref: [Kp, Np], b_ref: [1, Np], o_ref: [Bp, Np]
    acc = jnp.dot(x_ref[...], w_ref[...], preferred_element_type=jnp.float32)
    o_ref[...] = (acc + b_ref[...].astype(jnp.float32)).astype(o_ref.dtype)


def _linear_small(x, weight_t, bias2d, out_dtype):
    B, K = x.shape
    _, N = weight_t.shape
    Bp = _round_up(B, 8)      # sublane multiple
    Kp = _round_up(K, 128)    # lane-dense contraction dim
    Np = _round_up(N, 128)    # lane-dense output dim -> unmasked stores

    xp = jnp.pad(x, ((0, Bp - B), (0, Kp - K)))
    wp = jnp.pad(weight_t, ((0, Kp - K), (0, Np - N)))
    bp = jnp.pad(bias2d, ((0, 0), (0, Np - N)))

    cost = pl.CostEstimate(
        flops=2 * B * K * N,
        transcendentals=0,
        bytes_accessed=4 * (B * K + K * N + B * N + N),
    )

    yp = pl.pallas_call(
        _linear_kernel_single,
        out_shape=jax.ShapeDtypeStruct((Bp, Np), out_dtype),
        in_specs=[
            pl.BlockSpec(memory_space=pltpu.MemorySpace.VMEM),
            pl.BlockSpec(memory_space=pltpu.MemorySpace.VMEM),
            pl.BlockSpec(memory_space=pltpu.MemorySpace.VMEM),
        ],
        out_specs=pl.BlockSpec(memory_space=pltpu.MemorySpace.VMEM),
        cost_estimate=cost,
    )(xp, wp, bp)
    return yp[:B, :N]


# ---------------------------------------------------------------------------
# Tiled path for non-trivial shapes: pipelined (parallel, parallel, arbitrary)
# grid with a VMEM f32 accumulator and an f32 bias epilogue.
# ---------------------------------------------------------------------------
def _linear_kernel_tiled(x_ref, w_ref, b_ref, o_ref, acc_ref):
    @pl.when(pl.program_id(2) == 0)
    def _():
        acc_ref[...] = jnp.zeros_like(acc_ref)

    acc_ref[...] += jnp.dot(
        x_ref[...], w_ref[...], preferred_element_type=jnp.float32
    )

    @pl.when(pl.program_id(2) == pl.num_programs(2) - 1)
    def _():
        o_ref[...] = (acc_ref[...] + b_ref[...].astype(jnp.float32)).astype(o_ref.dtype)


def _linear_tiled(x, weight_t, bias2d, out_dtype, tm, tn, tk):
    B, K = x.shape
    _, N = weight_t.shape
    Bp = _round_up(B, tm)
    Kp = _round_up(K, tk)
    Np = _round_up(N, tn)
    if (Bp, Kp) != (B, K):
        x = jnp.pad(x, ((0, Bp - B), (0, Kp - K)))
    if (Kp, Np) != (K, N):
        weight_t = jnp.pad(weight_t, ((0, Kp - K), (0, Np - N)))
    if Np != N:
        bias2d = jnp.pad(bias2d, ((0, 0), (0, Np - N)))

    grid = (Bp // tm, Np // tn, Kp // tk)
    cost = pl.CostEstimate(
        flops=2 * Bp * Kp * Np,
        transcendentals=0,
        bytes_accessed=(
            x.dtype.itemsize * (Bp * Kp + Kp * Np)
            + 4 * Np
            + jnp.dtype(out_dtype).itemsize * Bp * Np
        ),
    )

    yp = pl.pallas_call(
        _linear_kernel_tiled,
        out_shape=jax.ShapeDtypeStruct((Bp, Np), out_dtype),
        grid_spec=pltpu.PrefetchScalarGridSpec(
            num_scalar_prefetch=0,
            grid=grid,
            in_specs=[
                pl.BlockSpec((tm, tk), lambda i, j, k: (i, k)),
                pl.BlockSpec((tk, tn), lambda i, j, k: (k, j)),
                pl.BlockSpec((1, tn), lambda i, j, k: (0, j)),
            ],
            out_specs=pl.BlockSpec((tm, tn), lambda i, j, k: (i, j)),
            scratch_shapes=[pltpu.VMEM((tm, tn), jnp.float32)],
        ),
        compiler_params=pltpu.CompilerParams(
            dimension_semantics=("parallel", "parallel", "arbitrary"),
            vmem_limit_bytes=32 * 1024 * 1024,  # safe on v5e/v6e (128 MiB) and v7x (64 MiB)
        ),
        cost_estimate=cost,
    )(x, weight_t, bias2d)

    if (Bp, Np) != (B, N):
        yp = yp[:B, :N]
    return yp


def linear_pallas(x, weight_t, bias, *, out_dtype=None, tm=128, tn=128, tk=128):
    """F_network.forward: y = x @ weight_t + bias.

    x:        [B, K]
    weight_t: [K, N]   (transpose of the PyTorch nn.Linear weight [N, K],
                        materialized once at init — not per call)
    bias:     [N]      (kept in f32 for the epilogue add)
    """
    B, K = x.shape
    K2, N = weight_t.shape
    assert K == K2, "weight_t must be [input_size, output_size]"
    if out_dtype is None:
        out_dtype = x.dtype
    bias2d = bias.reshape(1, N).astype(jnp.float32)

    if B <= tm and N <= tn and K <= tk:
        # One MXU pass: fixed pallas_call overhead dominates; keep it a single
        # un-gridded, lane-dense call.
        return _linear_small(x, weight_t, bias2d, out_dtype)
    return _linear_tiled(x, weight_t, bias2d, out_dtype, tm, tn, tk)


if __name__ == "__main__":
    # ------------------------------------------------------------------
    # 1) Shapes implied by the module: F_network(input_size=32, output_size=16)
    # ------------------------------------------------------------------
    batch, input_size, output_size = 8, 32, 16
    key = jax.random.PRNGKey(0)
    kx, kw, kb = jax.random.split(key, 3)

    x = jax.random.normal(kx, (batch, input_size), dtype=jnp.float32)
    bound = 1.0 / (input_size ** 0.5)
    # PyTorch nn.Linear weight is [out, in]; transpose ONCE at init.
    weight = jax.random.uniform(
        kw, (output_size, input_size), minval=-bound, maxval=bound, dtype=jnp.float32
    )
    bias = jax.random.uniform(
        kb, (output_size,), minval=-bound, maxval=bound, dtype=jnp.float32
    )
    weight_t = jnp.asarray(weight.T)  # [K, N], resident, no per-call transpose

    fwd = jax.jit(linear_pallas)
    y = jax.block_until_ready(fwd(x, weight_t, bias))
    y_ref = x @ weight_t + bias[None, :]
    assert y.shape == (batch, output_size)
    assert jnp.allclose(y, y_ref, atol=1e-4, rtol=1e-4)

    # ------------------------------------------------------------------
    # 2) Larger instance exercising the tiled, bf16-MXU path
    #    (amortizes the per-call overhead the review flagged).
    # ------------------------------------------------------------------
    B2, K2, N2 = 256, 256, 256
    kx2, kw2, kb2 = jax.random.split(jax.random.PRNGKey(1), 3)
    bound2 = 1.0 / (K2 ** 0.5)
    x2 = jax.random.normal(kx2, (B2, K2), dtype=jnp.float32).astype(jnp.bfloat16)
    w2 = jax.random.uniform(
        kw2, (K2, N2), minval=-bound2, maxval=bound2, dtype=jnp.float32
    ).astype(jnp.bfloat16)
    b2 = jax.random.uniform(
        kb2, (N2,), minval=-bound2, maxval=bound2, dtype=jnp.float32
    )

    fwd_tiled = jax.jit(functools.partial(linear_pallas, out_dtype=jnp.float32))
    y2 = jax.block_until_ready(fwd_tiled(x2, w2, b2))
    y2_ref = jnp.dot(x2, w2, preferred_element_type=jnp.float32) + b2[None, :]
    assert y2.shape == (B2, N2)
    assert jnp.allclose(y2, y2_ref, atol=1e-3, rtol=1e-3)

    print("KERNEL_OK")
</pallas_src>

<mosaic_0001>
module attributes {stable_mosaic.version = 11 : i64} {
  func.func @_linear_kernel_single(%arg0: memref<8x128xf32, #tpu.memory_space<vmem>>, %arg1: memref<128x128xf32, #tpu.memory_space<vmem>>, %arg2: memref<1x128xf32, #tpu.memory_space<vmem>>, %arg3: memref<8x128xf32, #tpu.memory_space<vmem>>) attributes {dimension_semantics = [], scalar_prefetch = 0 : i64, scratch_operands = 0 : i64, tpu.core_type = #tpu.core_type<tc>} {
    %c0 = arith.constant 0 : index
    %c0_0 = arith.constant 0 : index
    %0 = vector.load %arg0[%c0, %c0_0] : memref<8x128xf32, #tpu.memory_space<vmem>>, vector<8x128xf32>
    %c0_1 = arith.constant 0 : index
    %c0_2 = arith.constant 0 : index
    %1 = vector.load %arg1[%c0_1, %c0_2] : memref<128x128xf32, #tpu.memory_space<vmem>>, vector<128x128xf32>
    %cst = arith.constant dense<0.000000e+00> : vector<8x128xf32>
    %2 = tpu.matmul %0, %1, %cst {dimension_numbers = #tpu.dot_dimension_numbers<[1], [0], [0], [1], [0, 0, 1, 1], [], []>} : vector<8x128xf32>, vector<128x128xf32>, vector<8x128xf32> -> vector<8x128xf32>
    %c0_3 = arith.constant 0 : index
    %c0_4 = arith.constant 0 : index
    %3 = vector.load %arg2[%c0_3, %c0_4] : memref<1x128xf32, #tpu.memory_space<vmem>>, vector<1x128xf32>
    %4 = vector.broadcast %3 : vector<1x128xf32> to vector<8x128xf32>
    %5 = arith.addf %2, %4 : vector<8x128xf32>
    %c0_5 = arith.constant 0 : index
    %c0_6 = arith.constant 0 : index
    %6 = vector.load %arg3[%c0_5, %c0_6] : memref<8x128xf32, #tpu.memory_space<vmem>>, vector<8x128xf32>
    tpu.vector_store %arg3[%c0_5, %c0_6], %5 {strides = array<i32>} : memref<8x128xf32, #tpu.memory_space<vmem>>, vector<8x128xf32>,
    return
  }
}

</mosaic_0001>

<bundles_post_ra>
// kernel: linear_pallas.1
= control target key start
LH: loop header
LB: loop body
LE: loop exit
PB: predicated region body
PF: predicated region fallthrough
CT: control target
= control target key end

     0   :  { %v229_v3 = vmov 0.0|0.0   ;;  %vm230_vm0 = vmmov 0   ;;  %v231_v6 = vmov 0.0   ;;  %s319_s0 = inlined_call_operand.vmem [shape: f32[8,128], index: 0, kind: input, shape index: {}]   ;;  %s320_s1 = inlined_call_operand.vmem [shape: f32[128,128], index: 1, kind: input, shape index: {}]   ;;  %s321_s2 = inlined_call_operand.vmem [shape: f32[1,128], index: 2, kind: input, shape index: {}]   ;;  %s322_s3 = inlined_call_operand.hbm [shape: f32[8,128], index: 3, kind: output, shape index: {}]  }
   0x1   :  { %v16_v0 = vld [vmem:[%s320_s1] sm:$0xff]  ;;  %v17_v1 = vld [vmem:[%s320_s1 + $0x8] sm:$0xff]  ;;  %v18_v2 = vld [vmem:[%s320_s1 + $0x10] sm:$0xff]  ;;  %177 = vmatprep.subr.bf16.mxu0 %v229_v3  ;;  %174 = vmatprep.mubr.msk.f32.mxu0 %vm230_vm0, %v231_v6 }
   0x2   :  { %v178_v4 = vpack.c.bf16 %v17_v1, %v16_v0  ;;  %v19_v5 = vld [vmem:[%s320_s1 + $0x18] sm:$0xff]  ;;  %v20_v8 = vld [vmem:[%s320_s1 + $0x20] sm:$0xff]  ;;  %v21_v9 = vld [vmem:[%s320_s1 + $0x28] sm:$0xff] }
   0x3   :  { %v181_v7 = vpack.c.bf16 %v19_v5, %v18_v2 }
   0x4   :  { %179 = vmatpush3.bf16.msra.mxu0 %v178_v4 }
   0x5   :  { %180 = vmatprep.subr.bf16.mxu0 %v229_v3 }
   0x6   :  { %8 = vsyncpa [#allocation3], 0  ;;  %v184_v10 = vpack.c.bf16 %v21_v9, %v20_v8  ;;  %v22_v11 = vld [vmem:[%s320_s1 + $0x30] sm:$0xff]  ;;  %v23_v12 = vld [vmem:[%s320_s1 + $0x38] sm:$0xff]  ;;  %s232_s21 = smov [#allocation2]  }
   0x7   :  { %v187_v13 = vpack.c.bf16 %v23_v12, %v22_v11  ;;  %v24_v14 = vld [vmem:[%s320_s1 + $0x40] sm:$0xff]  ;;  %v25_v15 = vld [vmem:[%s320_s1 + $0x48] sm:$0xff]  ;;  %v26_v17 = vld [vmem:[%s320_s1 + $0x50] sm:$0xff]  ;;  %s116_s22 = sshll.u32 %s232_s21, 4  ;;  %s117_s22 = int_to_ptr.vmem [resolvable:$true] %s116_s22 }
   0x8   :  { %182 = vmatpush3.bf16.msra.mxu0 %v181_v7  ;;  %v190_v16 = vpack.c.bf16 %v25_v15, %v24_v14  ;;  %v27_v18 = vld [vmem:[%s320_s1 + $0x58] sm:$0xff]  ;;  %v28_v20 = vld [vmem:[%s320_s1 + $0x60] sm:$0xff]  ;;  %v29_v21 = vld [vmem:[%s320_s1 + $0x68] sm:$0xff]  ;;  %p210_p1 = scmp.lt.s32.totalorder %s117_s22, %s117_s22 }
   0x9   :  { %183 = vmatprep.subr.bf16.mxu0 %v229_v3  ;;  %v193_v19 = vpack.c.bf16 %v27_v18, %v26_v17  ;;  %v196_v22 = vpack.c.bf16 %v29_v21, %v28_v20  ;;  %v30_v23 = vld [vmem:[%s320_s1 + $0x70] sm:$0xff]  ;;  %v31_v24 = vld [vmem:[%s320_s1 + $0x78] sm:$0xff]  ;;  %v15_v26 = vld [vmem:[%s319_s0] sm:$0xff]  ;;  %s205_s1 = scalar_lea.vmem %s117_s22, 128 }
   0xa   :  { %v199_v25 = vpack.c.bf16 %v31_v24, %v30_v23  ;;  %v124_v27 = vld [vmem:[%s321_s2] ss:$0 sm:$0xff]  ;;  %p206_p0 = scmp.ne.s32.totalorder %s117_s22, %s205_s1  ;;  %p211_p2 = scmp.lt.s32.totalorder %s205_s1, %s205_s1 }
   0xc   :  { %185 = vmatpush3.bf16.msra.mxu0 %v184_v10  ;;  %p212_p3 = por %p211_p2, %p210_p1 }
   0xd   :  { %186 = vmatprep.subr.bf16.mxu0 %v229_v3 }
   0xe   :  { %p213_p4 = pnand %p212_p3, %p206_p0 }
  0x10   :  { %188 = vmatpush3.bf16.msra.mxu0 %v187_v13 }
  0x11   :  { %189 = vmatprep.subr.bf16.mxu0 %v229_v3 }
  0x14   :  { %191 = vmatpush3.bf16.msra.mxu0 %v190_v16 }
  0x15   :  { %192 = vmatprep.subr.bf16.mxu0 %v229_v3 }
  0x18   :  { %194 = vmatpush3.bf16.msra.mxu0 %v193_v19 }
  0x19   :  { %195 = vmatprep.subr.bf16.mxu0 %v229_v3 }
  0x1c   :  { %197 = vmatpush3.bf16.msra.mxu0 %v196_v22 }
  0x1d   :  { %198 = vmatprep.subr.bf16.mxu0 %v229_v3 }
  0x20   :  { %200 = vmatpush3.bf16.msra.mxu0 %v199_v25 }
  0x23   :  { %175 = vmatmul.mubr.f32.vlgmr.msra.gmra.mrb[0].mxu0 %v15_v26 }
  0xf6   :  { %v105_v28 = vpop.f32.mrb[0].mxu0 }
  0xf7   :  { %v106_v29 = vadd.f32 %v124_v27, %v105_v28  ;;  %v176_v30 = vpop.f32.mrb[1].mxu0 }
  0xf9   :  { %109 = vst [vmem:[#allocation2] sm:$0xff] %v106_v29 }
  0xfa   :  { %216 = shalt.err (!%p213_p4)
}
  0xfb   :  { %s217_s24 = scalar_lea.hbm %s322_s3, 128 }
  0xfc   :  { %p218_p5 = scmp.ne.s32.totalorder %s322_s3, %s217_s24  ;;  %p221_p6 = scmp.lt.u32.totalorder %s217_s24, %s322_s3 }
  0xfe   :  { %p223_p7 = pnand %p221_p6, %p218_p5 }
 0x100   :  { %226 = shalt.err (!%p223_p7)
}
 0x101   :  { %119 = dma.vmem_to_hbm [thread:$0]  %s117_s22, 128, %s322_s3, [#allocation3]  }
 0x102   :  { %227 = dma.done.wait [#allocation3], 128  }
 0x103   :  { %228 = vsyncadd [#allocation3], 4294967168 }
 0x104   :  { %123 = vsyncpa [#allocation3], 1 }

</bundles_post_ra>
